<compile_context>
chip_gen: v5e
topology: v5e:2x2
jax: 0.10.0
libtpu: 0.0.40
codegen_flags: <defaults>
</compile_context>

<pallas_src>
import functools

import jax
import jax.numpy as jnp
from jax.experimental import pallas as pl
from jax.experimental.pallas import tpu as pltpu

LANE = 128
_EPS = 1e-3


def _cdiv(a, b):
    return -(-a // b)


def _round_up(a, b):
    return _cdiv(a, b) * b


def _dice_kernel(x_ref, t_ref, a_ref, b_ref, c_ref, acc_ref, *,
                 tm, kb_per_split, n_splits, tail_rows, need_mask):
    s = pl.program_id(0)          # reduction split (v7x core split), "parallel"
    k = pl.program_id(2)          # row-block within this split, "arbitrary"

    @pl.when(k == 0)
    def _():
        acc_ref[...] = jnp.zeros_like(acc_ref)

    x = x_ref[0].astype(jnp.float32)          # (tm, 128)
    t = t_ref[0].astype(jnp.float32)          # (tm, 128)

    def accum(xv, tv):
        if tm % 8 == 0:
            # (tm//8, 8, 128): reduce over axis 0 = per-vreg VPU adds only;
            # the cross-sublane/lane collapse is deferred to the epilogue.
            xr = xv.reshape(tm // 8, 8, LANE)
            tr = tv.reshape(tm // 8, 8, LANE)
            acc_ref[0] += jnp.sum(xr * tr, axis=0)
            acc_ref[1] += jnp.sum(xr * xr, axis=0)
            acc_ref[2] += jnp.sum(tr * tr, axis=0)
        else:
            # Tiny single-block case (tm == rows < 8 or not a multiple of 8).
            acc_ref[0, 0:1, :] += jnp.sum(xv * tv, axis=0, keepdims=True)
            acc_ref[1, 0:1, :] += jnp.sum(xv * xv, axis=0, keepdims=True)
            acc_ref[2, 0:1, :] += jnp.sum(tv * tv, axis=0, keepdims=True)

    if need_mask:
        # Only the globally-last row-block is ragged; edge-block rows beyond the
        # array bound hold unspecified data, so mask BOTH operands before any product.
        is_ragged = jnp.logical_and(s == n_splits - 1, k == kb_per_split - 1)

        @pl.when(jnp.logical_not(is_ragged))
        def _():
            accum(x, t)

        @pl.when(is_ragged)
        def _():
            row = jax.lax.broadcasted_iota(jnp.int32, (tm, LANE), 0)
            keep = row < tail_rows
            accum(jnp.where(keep, x, 0.0), jnp.where(keep, t, 0.0))
    else:
        accum(x, t)

    @pl.when(k == kb_per_split - 1)
    def _():
        a_ref[...] = jnp.full(a_ref.shape, jnp.sum(acc_ref[0]), dtype=a_ref.dtype)
        b_ref[...] = jnp.full(b_ref.shape, jnp.sum(acc_ref[1]), dtype=b_ref.dtype)
        c_ref[...] = jnp.full(c_ref.shape, jnp.sum(acc_ref[2]), dtype=c_ref.dtype)


def dice_loss(input, target, edge=None, *, block_bytes=2 << 20):
    """Pallas-TPU forward of DiceLoss.  `edge` is unused (matches the module)."""
    del edge  # DiceLoss.forward ignores it
    n = input.shape[0]
    assert target.shape[0] == n
    m = input.size // n
    assert target.size // n == m, "input/target must flatten to the same per-example size"

    x2 = input.reshape(n, m)
    t2 = target.reshape(n, m)

    # Only the sub-128 lane tail is padded (rare); zero padding is exact for dice.
    m_pad = _round_up(m, LANE)
    if m_pad != m:
        x2 = jnp.pad(x2, ((0, 0), (0, m_pad - m)))
        t2 = jnp.pad(t2, ((0, 0), (0, m_pad - m)))
    rows = m_pad // LANE

    # Balanced row-block sizing: target ~block_bytes per operand per step.
    itemsize = max(jnp.dtype(input.dtype).itemsize, jnp.dtype(target.dtype).itemsize)
    tm_max = max(8, (block_bytes // (LANE * itemsize)) // 8 * 8)

    k_blocks = _cdiv(rows, tm_max)
    if n == 1 and k_blocks % 2 == 1 and rows > 8:
        k_blocks += 1            # try for an even #blocks so the reduction splits on v7x
    if k_blocks == 1:
        tm = rows                # block == full dim: always legal, no masking needed
    else:
        tm = _round_up(_cdiv(rows, k_blocks), 8)
    k_blocks = _cdiv(rows, tm)

    tail_rows = rows - (k_blocks - 1) * tm
    need_mask = tail_rows < tm

    # 2-way split of the row reduction across cores when the batch axis can't feed
    # both v7x TensorCores.  Harmless (sequential) on single-TC v5e/v6e.
    n_splits = 2 if (n == 1 and k_blocks >= 2 and k_blocks % 2 == 0) else 1
    kb_per_split = k_blocks // n_splits

    x3 = x2.reshape(n, rows, LANE)
    t3 = t2.reshape(n, rows, LANE)

    kernel = functools.partial(
        _dice_kernel, tm=tm, kb_per_split=kb_per_split, n_splits=n_splits,
        tail_rows=tail_rows, need_mask=need_mask)

    out_sds = jax.ShapeDtypeStruct((n_splits, n, 1, 1), jnp.float32)
    in_map = lambda s, i, k: (i, s * kb_per_split + k, 0)
    out_map = lambda s, i, k: (s, i, 0, 0)

    a_p, b_p, c_p = pl.pallas_call(
        kernel,
        out_shape=(out_sds, out_sds, out_sds),
        grid_spec=pltpu.PrefetchScalarGridSpec(
            num_scalar_prefetch=0,
            grid=(n_splits, n, kb_per_split),
            in_specs=[
                pl.BlockSpec((1, tm, LANE), in_map),
                pl.BlockSpec((1, tm, LANE), in_map),
            ],
            out_specs=(
                pl.BlockSpec((1, 1, 1, 1), out_map),
                pl.BlockSpec((1, 1, 1, 1), out_map),
                pl.BlockSpec((1, 1, 1, 1), out_map),
            ),
            scratch_shapes=[pltpu.VMEM((3, 8, LANE), jnp.float32)],
        ),
        compiler_params=pltpu.CompilerParams(
            dimension_semantics=("parallel", "parallel", "arbitrary"),
            vmem_limit_bytes=32 * 1024 * 1024),
    )(x3, t3)

    # Tiny O(N) epilogue (combines the per-split partial sums).
    a = a_p.reshape(n_splits, n).sum(axis=0)
    b = b_p.reshape(n_splits, n).sum(axis=0) + _EPS
    c = c_p.reshape(n_splits, n).sum(axis=0) + _EPS
    return 1.0 - 2.0 * a / (b + c)


def _reference(input, target):
    n = input.shape[0]
    x = input.reshape(n, -1).astype(jnp.float32)
    t = target.reshape(n, -1).astype(jnp.float32)
    a = jnp.sum(x * t, axis=1)
    b = jnp.sum(x * x, axis=1) + _EPS
    c = jnp.sum(t * t, axis=1) + _EPS
    return 1.0 - 2.0 * a / (b + c)


if __name__ == "__main__":
    key = jax.random.PRNGKey(0)
    k1, k2, k3, k4, k5, k6 = jax.random.split(key, 6)

    # 1) NCHW dense-prediction inputs (N, C, H, W) = (2, 4, 16, 16), f32.
    x = jax.nn.sigmoid(jax.random.normal(k1, (2, 4, 16, 16), dtype=jnp.float32))
    t = (jax.random.uniform(k2, (2, 4, 16, 16)) > 0.5).astype(jnp.float32)
    edge = jnp.zeros((2, 1, 16, 16), dtype=jnp.float32)   # unused by forward
    got = jax.block_until_ready(dice_loss(x, t, edge))
    ref = _reference(x, t)
    assert jnp.allclose(got, ref, rtol=1e-5, atol=1e-5), (got, ref)

    # 2) Odd feature count (lane-tail pad, tiny single block) + native bf16 inputs.
    xb = jax.nn.sigmoid(jax.random.normal(k3, (2, 3, 7, 11), dtype=jnp.bfloat16))
    tb = (jax.random.uniform(k4, (2, 3, 7, 11)) > 0.5).astype(jnp.bfloat16)
    got2 = jax.block_until_ready(dice_loss(xb, tb))
    ref2 = _reference(xb, tb)
    assert jnp.allclose(got2, ref2, rtol=1e-5, atol=1e-5), (got2, ref2)

    # 3) Multi-block reduction with a ragged (in-kernel masked) last row-block.
    xc = jax.nn.sigmoid(jax.random.normal(k5, (1, 9, 16, 16), dtype=jnp.float32))
    tc = (jax.random.uniform(k6, (1, 9, 16, 16)) > 0.5).astype(jnp.float32)
    got3 = jax.block_until_ready(dice_loss(xc, tc, block_bytes=8 * LANE * 4))
    ref3 = _reference(xc, tc)
    assert jnp.allclose(got3, ref3, rtol=1e-5, atol=1e-5), (got3, ref3)

    # 4) N==1 with an even number of reduction blocks -> 2-way split path (v7x megacore).
    xd = jax.nn.sigmoid(jax.random.normal(k5, (1, 8, 32, 32), dtype=jnp.float32))
    td = (jax.random.uniform(k6, (1, 8, 32, 32)) > 0.5).astype(jnp.float32)
    got4 = jax.block_until_ready(dice_loss(xd, td, block_bytes=8 * LANE * 4))
    ref4 = _reference(xd, td)
    assert jnp.allclose(got4, ref4, rtol=1e-5, atol=1e-5), (got4, ref4)

    print("KERNEL_OK")
</pallas_src>

<mosaic_0001>
module attributes {stable_mosaic.version = 11 : i64} {
  func.func @_dice_kernel(%arg0: i32, %arg1: i32, %arg2: i32, %arg3: memref<1x8x128xf32, #tpu.memory_space<vmem>>, %arg4: memref<1x8x128xf32, #tpu.memory_space<vmem>>, %arg5: memref<1x1x1x1xf32, #tpu.memory_space<vmem>>, %arg6: memref<1x1x1x1xf32, #tpu.memory_space<vmem>>, %arg7: memref<1x1x1x1xf32, #tpu.memory_space<vmem>>, %arg8: memref<3x8x128xf32, #tpu.memory_space<vmem>>) attributes {dimension_semantics = [#tpu.dimension_semantics<parallel>, #tpu.dimension_semantics<parallel>, #tpu.dimension_semantics<arbitrary>], iteration_bounds = array<i64: 1, 2, 1>, scalar_prefetch = 0 : i64, scratch_operands = 1 : i64, tpu.core_type = #tpu.core_type<tc>, window_params = [{transform_indices = @transform_0, window_bounds = array<i64: 1, 8, 128>}, {transform_indices = @transform_1, window_bounds = array<i64: 1, 8, 128>}, {transform_indices = @transform_2, window_bounds = array<i64: 1, 1, 1, 1>}, {transform_indices = @transform_3, window_bounds = array<i64: 1, 1, 1, 1>}, {transform_indices = @transform_4, window_bounds = array<i64: 1, 1, 1, 1>}]} {
    %c0_i32 = arith.constant 0 : i32
    %0 = arith.cmpi eq, %arg2, %c0_i32 : i32
    %1 = arith.extui %0 : i1 to i32
    %c0_i32_0 = arith.constant 0 : i32
    %2 = arith.cmpi ne, %1, %c0_i32_0 : i32
    scf.if %2 {
      %cst_26 = arith.constant 0.000000e+00 : f32
      %36 = vector.broadcast %cst_26 : f32 to vector<3x8x128xf32>
      %c0_27 = arith.constant 0 : index
      %c0_28 = arith.constant 0 : index
      %c0_29 = arith.constant 0 : index
      %37 = vector.load %arg8[%c0_27, %c0_28, %c0_29] : memref<3x8x128xf32, #tpu.memory_space<vmem>>, vector<3x8x128xf32>
      tpu.vector_store %arg8[%c0_27, %c0_28, %c0_29], %36 {strides = array<i32>} : memref<3x8x128xf32, #tpu.memory_space<vmem>>, vector<3x8x128xf32>,
    } else {
    }
    %c0 = arith.constant 0 : index
    %c0_1 = arith.constant 0 : index
    %c0_2 = arith.constant 0 : index
    %3 = vector.load %arg3[%c0, %c0_1, %c0_2] : memref<1x8x128xf32, #tpu.memory_space<vmem>>, vector<1x8x128xf32>
    %4 = vector.shape_cast %3 : vector<1x8x128xf32> to vector<8x128xf32>
    %c0_3 = arith.constant 0 : index
    %c0_4 = arith.constant 0 : index
    %c0_5 = arith.constant 0 : index
    %5 = vector.load %arg4[%c0_3, %c0_4, %c0_5] : memref<1x8x128xf32, #tpu.memory_space<vmem>>, vector<1x8x128xf32>
    %6 = vector.shape_cast %5 : vector<1x8x128xf32> to vector<8x128xf32>
    %7 = vector.shape_cast %4 : vector<8x128xf32> to vector<1x8x128xf32>
    %8 = vector.shape_cast %6 : vector<8x128xf32> to vector<1x8x128xf32>
    %c0_6 = arith.constant 0 : index
    %c0_7 = arith.constant 0 : index
    %c0_8 = arith.constant 0 : index
    %9 = vector.load %arg8[%c0_6, %c0_7, %c0_8] : memref<3x8x128xf32, #tpu.memory_space<vmem>>, vector<1x8x128xf32>
    %10 = vector.shape_cast %9 : vector<1x8x128xf32> to vector<8x128xf32>
    %11 = arith.mulf %7, %8 : vector<1x8x128xf32>
    %cst = arith.constant dense<0.000000e+00> : vector<8x128xf32>
    %12 = vector.multi_reduction <add>, %11, %cst [0] : vector<1x8x128xf32> to vector<8x128xf32>
    %13 = arith.addf %10, %12 : vector<8x128xf32>
    %c0_9 = arith.constant 0 : index
    %c0_10 = arith.constant 0 : index
    %c0_11 = arith.constant 0 : index
    %14 = vector.load %arg8[%c0_9, %c0_10, %c0_11] : memref<3x8x128xf32, #tpu.memory_space<vmem>>, vector<1x8x128xf32>
    %15 = vector.shape_cast %14 : vector<1x8x128xf32> to vector<8x128xf32>
    %16 = vector.shape_cast %13 : vector<8x128xf32> to vector<1x8x128xf32>
    tpu.vector_store %arg8[%c0_9, %c0_10, %c0_11], %16 {strides = array<i32>} : memref<3x8x128xf32, #tpu.memory_space<vmem>>, vector<1x8x128xf32>,
    %c1 = arith.constant 1 : index
    %c0_12 = arith.constant 0 : index
    %c0_13 = arith.constant 0 : index
    %17 = vector.load %arg8[%c1, %c0_12, %c0_13] : memref<3x8x128xf32, #tpu.memory_space<vmem>>, vector<1x8x128xf32>
    %18 = vector.shape_cast %17 : vector<1x8x128xf32> to vector<8x128xf32>
    %19 = arith.mulf %7, %7 : vector<1x8x128xf32>
    %cst_14 = arith.constant dense<0.000000e+00> : vector<8x128xf32>
    %20 = vector.multi_reduction <add>, %19, %cst_14 [0] : vector<1x8x128xf32> to vector<8x128xf32>
    %21 = arith.addf %18, %20 : vector<8x128xf32>
    %c1_15 = arith.constant 1 : index
    %c0_16 = arith.constant 0 : index
    %c0_17 = arith.constant 0 : index
    %22 = vector.load %arg8[%c1_15, %c0_16, %c0_17] : memref<3x8x128xf32, #tpu.memory_space<vmem>>, vector<1x8x128xf32>
    %23 = vector.shape_cast %22 : vector<1x8x128xf32> to vector<8x128xf32>
    %24 = vector.shape_cast %21 : vector<8x128xf32> to vector<1x8x128xf32>
    tpu.vector_store %arg8[%c1_15, %c0_16, %c0_17], %24 {strides = array<i32>} : memref<3x8x128xf32, #tpu.memory_space<vmem>>, vector<1x8x128xf32>,
    %c2 = arith.constant 2 : index
    %c0_18 = arith.constant 0 : index
    %c0_19 = arith.constant 0 : index
    %25 = vector.load %arg8[%c2, %c0_18, %c0_19] : memref<3x8x128xf32, #tpu.memory_space<vmem>>, vector<1x8x128xf32>
    %26 = vector.shape_cast %25 : vector<1x8x128xf32> to vector<8x128xf32>
    %27 = arith.mulf %8, %8 : vector<1x8x128xf32>
    %cst_20 = arith.constant dense<0.000000e+00> : vector<8x128xf32>
    %28 = vector.multi_reduction <add>, %27, %cst_20 [0] : vector<1x8x128xf32> to vector<8x128xf32>
    %29 = arith.addf %26, %28 : vector<8x128xf32>
    %c2_21 = arith.constant 2 : index
    %c0_22 = arith.constant 0 : index
    %c0_23 = arith.constant 0 : index
    %30 = vector.load %arg8[%c2_21, %c0_22, %c0_23] : memref<3x8x128xf32, #tpu.memory_space<vmem>>, vector<1x8x128xf32>
    %31 = vector.shape_cast %30 : vector<1x8x128xf32> to vector<8x128xf32>
    %32 = vector.shape_cast %29 : vector<8x128xf32> to vector<1x8x128xf32>
    tpu.vector_store %arg8[%c2_21, %c0_22, %c0_23], %32 {strides = array<i32>} : memref<3x8x128xf32, #tpu.memory_space<vmem>>, vector<1x8x128xf32>,
    %c0_i32_24 = arith.constant 0 : i32
    %33 = arith.cmpi eq, %arg2, %c0_i32_24 : i32
    %34 = arith.extui %33 : i1 to i32
    %c0_i32_25 = arith.constant 0 : i32
    %35 = arith.cmpi ne, %34, %c0_i32_25 : i32
    scf.if %35 {
      %c0_26 = arith.constant 0 : index
      %c0_27 = arith.constant 0 : index
      %c0_28 = arith.constant 0 : index
      %36 = vector.load %arg8[%c0_26, %c0_27, %c0_28] : memref<3x8x128xf32, #tpu.memory_space<vmem>>, vector<1x8x128xf32>
      %37 = vector.shape_cast %36 : vector<1x8x128xf32> to vector<8x128xf32>
      %38 = vector.shape_cast %37 : vector<8x128xf32> to vector<1x8x128xf32>
      %cst_29 = arith.constant dense<0.000000e+00> : vector<1xf32>
      %39 = vector.multi_reduction <add>, %38, %cst_29 [1, 2] : vector<1x8x128xf32> to vector<1xf32>
      %40 = vector.shape_cast %39 : vector<1xf32> to vector<1x1x1xf32>
      %41 = vector.extract %40[0, 0, 0] : f32 from vector<1x1x1xf32>
      %42 = vector.broadcast %41 : f32 to vector<1x1x1x1xf32>
      %c0_30 = arith.constant 0 : index
      %c0_31 = arith.constant 0 : index
      %c0_32 = arith.constant 0 : index
      %c0_33 = arith.constant 0 : index
      %43 = vector.load %arg5[%c0_30, %c0_31, %c0_32, %c0_33] : memref<1x1x1x1xf32, #tpu.memory_space<vmem>>, vector<1x1x1x1xf32>
      tpu.vector_store %arg5[%c0_30, %c0_31, %c0_32, %c0_33], %42 {strides = array<i32>} : memref<1x1x1x1xf32, #tpu.memory_space<vmem>>, vector<1x1x1x1xf32>,
      %c1_34 = arith.constant 1 : index
      %c0_35 = arith.constant 0 : index
      %c0_36 = arith.constant 0 : index
      %44 = vector.load %arg8[%c1_34, %c0_35, %c0_36] : memref<3x8x128xf32, #tpu.memory_space<vmem>>, vector<1x8x128xf32>
      %45 = vector.shape_cast %44 : vector<1x8x128xf32> to vector<8x128xf32>
      %46 = vector.shape_cast %45 : vector<8x128xf32> to vector<1x8x128xf32>
      %cst_37 = arith.constant dense<0.000000e+00> : vector<1xf32>
      %47 = vector.multi_reduction <add>, %46, %cst_37 [1, 2] : vector<1x8x128xf32> to vector<1xf32>
      %48 = vector.shape_cast %47 : vector<1xf32> to vector<1x1x1xf32>
      %49 = vector.extract %48[0, 0, 0] : f32 from vector<1x1x1xf32>
      %50 = vector.broadcast %49 : f32 to vector<1x1x1x1xf32>
      %c0_38 = arith.constant 0 : index
      %c0_39 = arith.constant 0 : index
      %c0_40 = arith.constant 0 : index
      %c0_41 = arith.constant 0 : index
      %51 = vector.load %arg6[%c0_38, %c0_39, %c0_40, %c0_41] : memref<1x1x1x1xf32, #tpu.memory_space<vmem>>, vector<1x1x1x1xf32>
      tpu.vector_store %arg6[%c0_38, %c0_39, %c0_40, %c0_41], %50 {strides = array<i32>} : memref<1x1x1x1xf32, #tpu.memory_space<vmem>>, vector<1x1x1x1xf32>,
      %c2_42 = arith.constant 2 : index
      %c0_43 = arith.constant 0 : index
      %c0_44 = arith.constant 0 : index
      %52 = vector.load %arg8[%c2_42, %c0_43, %c0_44] : memref<3x8x128xf32, #tpu.memory_space<vmem>>, vector<1x8x128xf32>
      %53 = vector.shape_cast %52 : vector<1x8x128xf32> to vector<8x128xf32>
      %54 = vector.shape_cast %53 : vector<8x128xf32> to vector<1x8x128xf32>
      %cst_45 = arith.constant dense<0.000000e+00> : vector<1xf32>
      %55 = vector.multi_reduction <add>, %54, %cst_45 [1, 2] : vector<1x8x128xf32> to vector<1xf32>
      %56 = vector.shape_cast %55 : vector<1xf32> to vector<1x1x1xf32>
      %57 = vector.extract %56[0, 0, 0] : f32 from vector<1x1x1xf32>
      %58 = vector.broadcast %57 : f32 to vector<1x1x1x1xf32>
      %c0_46 = arith.constant 0 : index
      %c0_47 = arith.constant 0 : index
      %c0_48 = arith.constant 0 : index
      %c0_49 = arith.constant 0 : index
      %59 = vector.load %arg7[%c0_46, %c0_47, %c0_48, %c0_49] : memref<1x1x1x1xf32, #tpu.memory_space<vmem>>, vector<1x1x1x1xf32>
      tpu.vector_store %arg7[%c0_46, %c0_47, %c0_48, %c0_49], %58 {strides = array<i32>} : memref<1x1x1x1xf32, #tpu.memory_space<vmem>>, vector<1x1x1x1xf32>,
    } else {
    }
    return
  }
  func.func @transform_0(%arg0: i32, %arg1: i32, %arg2: i32) -> (i32, i32, i32) {
    %c1_i32 = arith.constant 1 : i32
    %0 = arith.muli %arg0, %c1_i32 : i32
    %1 = arith.addi %0, %arg2 : i32
    %c0_i32 = arith.constant 0 : i32
    %c0_i32_0 = arith.constant 0 : i32
    return %arg1, %1, %c0_i32 : i32, i32, i32
  }
  func.func @transform_1(%arg0: i32, %arg1: i32, %arg2: i32) -> (i32, i32, i32) {
    %c1_i32 = arith.constant 1 : i32
    %0 = arith.muli %arg0, %c1_i32 : i32
    %1 = arith.addi %0, %arg2 : i32
    %c0_i32 = arith.constant 0 : i32
    %c0_i32_0 = arith.constant 0 : i32
    return %arg1, %1, %c0_i32 : i32, i32, i32
  }
  func.func @transform_2(%arg0: i32, %arg1: i32, %arg2: i32) -> (i32, i32, i32, i32) {
    %c0_i32 = arith.constant 0 : i32
    %c0_i32_0 = arith.constant 0 : i32
    %c0_i32_1 = arith.constant 0 : i32
    return %arg0, %arg1, %c0_i32, %c0_i32_0 : i32, i32, i32, i32
  }
  func.func @transform_3(%arg0: i32, %arg1: i32, %arg2: i32) -> (i32, i32, i32, i32) {
    %c0_i32 = arith.constant 0 : i32
    %c0_i32_0 = arith.constant 0 : i32
    %c0_i32_1 = arith.constant 0 : i32
    return %arg0, %arg1, %c0_i32, %c0_i32_0 : i32, i32, i32, i32
  }
  func.func @transform_4(%arg0: i32, %arg1: i32, %arg2: i32) -> (i32, i32, i32, i32) {
    %c0_i32 = arith.constant 0 : i32
    %c0_i32_0 = arith.constant 0 : i32
    %c0_i32_1 = arith.constant 0 : i32
    return %arg0, %arg1, %c0_i32, %c0_i32_0 : i32, i32, i32, i32
  }
}

</mosaic_0001>

<bundles_post_ra>
// kernel: tpu_custom_call.1
= control target key start
LH: loop header
LB: loop body
LE: loop exit
PB: predicated region body
PF: predicated region fallthrough
CT: control target
= control target key end

     0   :  { %10 = vsyncpa [#allocation4], 0  ;;  %s914_s0 = inlined_call_operand.hbm [shape: f32[2,8,128], index: 0, kind: input, shape index: {}]   ;;  %s915_s1 = inlined_call_operand.hbm [shape: f32[2,8,128], index: 1, kind: input, shape index: {}]   ;;  %s916_s2 = inlined_call_operand.vmem [shape: f32[1,2,1,1], index: 2, kind: output, shape index: {0}]   ;;  %s917_s3 = inlined_call_operand.vmem [shape: f32[1,2,1,1], index: 3, kind: output, shape index: {1}]   ;;  %s918_s4 = inlined_call_operand.vmem [shape: f32[1,2,1,1], index: 4, kind: output, shape index: {2}]  }
   0x1   :  { %12 = vsyncpa [#allocation4 + $0x1], 0 }
   0x2   :  { %13 = vsyncpa [#allocation6], 0 }
   0x3   :  { %15 = vsyncpa [#allocation6 + $0x1], 0  ;;  %s813_s15 = smov 0   ;;  %s815_s16 = smov 0  }
   0x4   :  { %s817_s17 = smov 0   ;;  %s819_s18 = smov 0  }
   0x5   :  { %s821_s19 = smov 0   ;;  %s823_s20 = smov 0  }
   0x6 LB: > { %s593_s21 = sadd.s32 4294967295, %s786_s20   ;;  %s36_s22 = sadd.s32 1, %s782_s19  ;;  %s786_s20 = sphi %s823_s20, %s21_s20   ;;  %s782_s19 = sphi %s821_s19, %s925_s19   ;;  %s778_s18 = sphi %s819_s18, %s924_s18   ;;  %s774_s17 = sphi %s817_s17, %s923_s17   ;;  %s770_s16 = sphi %s815_s16, %s922_s16   ;;  %s766_s15 = sphi %s813_s15, %s921_s15  }
   0x7   : > { %p38_p0 = scmp.ge.s32.totalorder %s36_s22, 2  ;;  %s51_s23 = sadd.s32 1, %s774_s17 }
   0x8   : > { %p58_p1 = scmp.ne.s32.totalorder %s774_s17, %s770_s16  ;;  %p59_p2 = scmp.eq.s32.totalorder %s786_s20, 0 }
   0x9   : > { %s927_s22 = smov (%p38_p0, %s36_s22), 0  ;;  %p64_p4 = scmp.ne.s32.totalorder %s770_s16, %s766_s15 }
   0xa   : > { %p849_p3 = por %p59_p2, %p58_p1  ;;  %s46_s25 = ssub.s32 %s782_s19, %s927_s22 }
   0xb   : > { %p65_p5 = scmp.eq.s32.totalorder %s593_s21, 0  ;;  %p49_p6 = scmp.eq.s32.totalorder %s46_s25, 0 }
   0xc   : > { %p623_p8 = scmp.lt.s32.totalorder %s786_s20, 2  ;;  %s202_s28 = sand.u32 1, %s774_s17  }
   0xd   : > { %p856_p7 = por %p65_p5, %p64_p4  ;;  %s598_s29 = sshll.u32 %s782_s19, 3 }
   0xe   : > { %s862_s27 = scalar_select %p49_p6, %s774_s17, %s51_s23  }
   0xf   : > { %s597_s30 = sshll.u32 %s202_s28, 3  ;;  %s212_s7 = scalar_lea.hbm %s914_s0, %s598_s29 }
  0x10   : > { %s214_s8 = sshll.u32 %s212_s7, 4  ;;  %s206_s9 = scalar_lea.vmem [#allocation3], %s597_s30  ;;  %s215_s8 = int_to_ptr.hbm [resolvable:$true] %s214_s8 }
  0x11   : > { %s216_s10 = sshll.u32 %s206_s9, 4  ;;  %p617_p9 = pnand %p623_p8, %p849_p3  ;;  %s217_s10 = int_to_ptr.vmem [resolvable:$true] %s216_s10 }
  0x12   : > { %p601_p10 = scmp.ge.s32.totalorder %s786_s20, 1  ;;  %p242_p11 = scmp.lt.s32.totalorder %s786_s20, 3 }
  0x13   : > { %s203_s11 = scalar_lea.sflag [#allocation4], %s202_s28  ;;  %s233_s14 = scalar_lea.hbm %s915_s1, %s598_s29 }
  0x14   : > { %619 = dma.hbm_to_vmem [thread:$0]  (!%p617_p9), %s215_s8, 128, %s217_s10, %s203_s11  }
  0x15   : > { %p243_p12 = pnand %p601_p10, %p242_p11  ;;  %s235_s15 = sshll.u32 %s233_s14, 4  ;;  %s236_s15 = int_to_ptr.hbm [resolvable:$true] %s235_s15 }
  0x16   : > { %s227_s21 = scalar_lea.vmem [#allocation5], %s597_s30  ;;  %s224_s25 = scalar_lea.sflag [#allocation6], %s202_s28 }
  0x17   : > { %s237_s23 = sshll.u32 %s227_s21, 4  ;;  %246 = sbr.rel (%p243_p12) target bundleno = 223 (0xdf), region = 28  ;;  %s238_s23 = int_to_ptr.vmem [resolvable:$true] %s237_s23 }
  0x18   : > { %622 = dma.hbm_to_vmem [thread:$0]  (!%p617_p9), %s236_s15, 128, %s238_s23, %s224_s25  }
  0x19   : > { %s248_s24 = sand.u32 (!%p243_p12), 1, %s770_s16  }
  0x1a   : > { %s602_s5 = sshll.u32 (!%p243_p12), %s248_s24, 3  ;;  %s249_s6 = scalar_lea.sflag (!%p243_p12), [#allocation4], %s248_s24 }
  0x1b   : > { %s252_s7 = scalar_lea.vmem (!%p243_p12), [#allocation3], %s602_s5 }
  0x1c   : > { %757 = dma.done.wait (%p856_p7), %s249_s6, 128  }
  0x1d   : > { %759 = vsyncadd (%p856_p7), %s249_s6, 4294967168  ;;  %s259_s29 = scalar_lea.sflag [#allocation6], %s248_s24  ;;  %s262_s30 = scalar_lea.vmem [#allocation5], %s602_s5 }
  0x1e   : > { %761 = dma.done.wait (%p856_p7), %s259_s29, 128  }
  0x1f   : > { %763 = vsyncadd (%p856_p7), %s259_s29, 4294967168  ;;  %v339_v0 = vld [vmem:[%s252_s7] sm:$0xff]  ;;  %v340_v1 = vld [vmem:[%s262_s30] sm:$0xff]  ;;  %p313_p13 = scmp.lt.s32.totalorder %s778_s18, 1  ;;  %vm372_vm0 = vcmask 0  }
  0x20   : > { %v342_v2 = vmul.f32 %v340_v1, %v339_v0  ;;  %v354_v3 = vmul.f32 %v340_v1, %v340_v1  ;;  %v348_v4 = vmul.f32 %v339_v0, %v339_v0 }
  0x21   : > { %s929_s18 = smov (!%p313_p13, %s778_s18), 1 }
  0x22   : > { %362 = vadd.xlane.f32.xlu0 %v342_v2  ;;  %387 = vadd.xlane.f32.xlu1 %v354_v3  ;;  %s317_s8 = scalar_lea.vmem %s916_s2, %s929_s18  ;;  %s324_s12 = scalar_lea.vmem %s917_s3, %s929_s18 }
  0x23   : > { %s331_s21 = scalar_lea.vmem %s918_s4, %s929_s18 }
  0x2a   : > { %375 = vadd.xlane.f32.xlu0 %v348_v4 }
  0x95   : > { %v363_v5 = vpop.xlane.xlu0 %362  ;;  %v388_v6 = vpop.xlane.xlu1 %387 }
  0x96   : > { %v364_v7 = vrot.slane %v363_v5, 4  ;;  %v389_v8 = vrot.slane %v388_v6, 4 }
  0x98   : > { %v365_v9 = vadd.f32 %v364_v7, %v363_v5  ;;  %v390_v10 = vadd.f32 %v389_v8, %v388_v6 }
  0x9a   : > { %v366_v11 = vrot.slane %v365_v9, 2  ;;  %v391_v13 = vrot.slane %v390_v10, 2 }
  0x9c   : > { %v367_v12 = vadd.f32 %v366_v11, %v365_v9  ;;  %v392_v19 = vadd.f32 %v391_v13, %v390_v10 }
  0x9d   : > { %v376_v14 = vpop.xlane.xlu0 %375 }
  0x9e   : > { %v377_v15 = vrot.slane %v376_v14, 4  ;;  %v368_v16 = vrot.slane %v367_v12, 1  ;;  %v393_v22 = vrot.slane %v392_v19, 1 }
  0xa0   : > { %v378_v17 = vadd.f32 %v377_v15, %v376_v14  ;;  %v369_v18 = vadd.f32 %v368_v16, %v367_v12  ;;  %v394_v25 = vadd.f32 %v393_v22, %v392_v19 }
  0xa2   : > { %v379_v20 = vrot.slane %v378_v17, 2  ;;  %606 = vpush %v369_v18 }
  0xa4   : > { %v380_v21 = vadd.f32 %v379_v20, %v378_v17 }
  0xa6   : > { %v381_v23 = vrot.slane %v380_v21, 1 }
  0xa8   : > { %v382_v24 = vadd.f32 %v381_v23, %v380_v21 }
  0xaa   : > { %608 = vpush %v382_v24 }
  0xab   : > { %610 = vpush %v394_v25 }
  0xd3   : > { %s607_s9 = spop %606 }
  0xd4   : > { %v371_v26 = vstv %s607_s9 }
  0xd5   : > { %373 = vst.msk [vmem:[%s317_s8] sm:$0x1] %vm372_vm0, %v371_v26 }
  0xdb   : > { %s609_s13 = spop %608 }
  0xdc   : > { %v384_v27 = vstv %s609_s13  ;;  %s611_s23 = spop %610 }
  0xdd   : > { %385 = vst.msk [vmem:[%s324_s12] sm:$0x1] %vm372_vm0, %v384_v27  ;;  %v396_v28 = vstv %s611_s23 }
  0xde   : > { %397 = vst.msk [vmem:[%s331_s21] sm:$0x1] %vm372_vm0, %v396_v28 }
  0xdf PF: > { %s21_s20 = sadd.s32 1, %s786_s20   ;;  %s921_s15 = smov %s770_s16 }
  0xe0   : > { %p18_p0 = scmp.ge.s32.totalorder %s21_s20, 4   ;;  %s922_s16 = smov %s774_s17 }
  0xe1   : > { %s923_s17 = smov %s862_s27  ;;  %s924_s18 = smov %s782_s19 }
  0xe2   : > { %s925_s19 = smov %s927_s22  ;;  %20 = sbr.rel (!%p18_p0) target bundleno = 6 (0x6), region = 115 }
  0xe7   :  { %463 = vsyncpa [#allocation4], 1 }
  0xe8   :  { %465 = vsyncpa [#allocation4 + $0x1], 1 }
  0xe9   :  { %466 = vsyncpa [#allocation6], 1 }
  0xea   :  { %468 = vsyncpa [#allocation6 + $0x1], 1 }

</bundles_post_ra>
